<compile_context>
chip_gen: v5e
topology: v5e:2x2
jax: 0.10.0
libtpu: 0.0.40
codegen_flags: <defaults>
</compile_context>

<pallas_src>
import functools

import jax
import jax.numpy as jnp
import numpy as np
from jax import lax
from jax.experimental import pallas as pl
from jax.experimental.pallas import tpu as pltpu


# ------------------------------ Pallas kernel ------------------------------ #
def moana_kernel(H, W, x_ref, pool_ref, bcast_ref, wh_ref, ww_ref, prm_ref, o_ref):
    Bt, C, HW = x_ref.shape

    # Per-channel parameter columns (C, 1): BN1-scaled conv_c taps + BN shifts.
    wc0 = prm_ref[:, 0:1]
    wc1 = prm_ref[:, 1:2]
    wc2 = prm_ref[:, 2:3]
    b1 = prm_ref[:, 3:4]
    b2 = prm_ref[:, 4:5]
    b3 = prm_ref[:, 5:6]

    pool_m = pool_ref[...]      # (HW, H+W)   pooling matrix
    bcast_m = bcast_ref[...]    # (H+W, HW)   broadcast/scatter matrix
    wh_cat = wh_ref[...]        # (C, 3C)     conv_h weights, BN2 scale folded in
    ww_cat = ww_ref[...]        # (C, 3C)     conv_w weights, BN3 scale folded in

    for b in range(Bt):                                   # static unroll
        xb = x_ref[b]                                     # (C, HW) lane-dense

        # ---- adaptive average pools as one MXU matmul --------------------- #
        pool = jnp.dot(xb, pool_m, preferred_element_type=jnp.float32)  # (C, H+W)
        y_h = pool[:, :H]                                 # (C, H)
        y_w = pool[:, H:]                                 # (C, W)
        y_c = jnp.mean(y_h, axis=1, keepdims=True)        # (C, 1)

        # ---- conv_c: 3-tap conv over channels, VPU only -------------------- #
        zc = jnp.zeros((1, 1), jnp.float32)
        y_cm1 = jnp.concatenate([zc, y_c[: C - 1, :]], axis=0)   # y_c[c-1], zero pad
        y_cp1 = jnp.concatenate([y_c[1:, :], zc], axis=0)        # y_c[c+1], zero pad
        s_c = jax.nn.sigmoid(wc0 * y_cm1 + wc1 * y_c + wc2 * y_cp1 + b1)   # (C, 1)

        # ---- conv_h: one fused (C,3C)@(3C,H) matmul ------------------------ #
        col = jnp.zeros((C, 1), jnp.float32)
        y_hm1 = jnp.concatenate([col, y_h[:, : H - 1]], axis=1)  # y_h[:, h-1]
        y_hp1 = jnp.concatenate([y_h[:, 1:], col], axis=1)       # y_h[:, h+1]
        yh3 = jnp.concatenate([y_hm1, y_h, y_hp1], axis=0)       # (3C, H)
        z_h = jnp.dot(wh_cat, yh3, preferred_element_type=jnp.float32)     # (C, H)
        s_hc = jax.nn.sigmoid(z_h + b2) + s_c                    # s_c folded in

        # ---- conv_w: one fused (C,3C)@(3C,W) matmul ------------------------ #
        y_wm1 = jnp.concatenate([col, y_w[:, : W - 1]], axis=1)
        y_wp1 = jnp.concatenate([y_w[:, 1:], col], axis=1)
        yw3 = jnp.concatenate([y_wm1, y_w, y_wp1], axis=0)       # (3C, W)
        z_w = jnp.dot(ww_cat, yw3, preferred_element_type=jnp.float32)     # (C, W)
        s_w = jax.nn.sigmoid(z_w + b3)                           # (C, W)

        # ---- broadcast back to (C, H*W) as one matmul, fused gated store --- #
        sv = jnp.concatenate([s_hc, s_w], axis=1)                # (C, H+W)
        att = jnp.dot(sv, bcast_m, preferred_element_type=jnp.float32)     # (C, HW)
        o_ref[b] = xb * (1.0 + att)


# ------------------------------ glue / setup ------------------------------- #
def _pool_and_bcast_mats(H, W):
    """M: (HW, H+W) averaging matrix; E: (H+W, HW) broadcast/scatter matrix."""
    HW = H * W
    j = np.arange(HW)
    hh = j // W
    wi = j % W
    M = np.zeros((HW, H + W), np.float32)
    M[j, hh] = 1.0 / W          # -> y_h (mean over W)
    M[j, H + wi] = 1.0 / H      # -> y_w (mean over H)
    E = np.zeros((H + W, HW), np.float32)
    E[hh, j] = 1.0              # s_h[c, h] -> all w
    E[H + wi, j] = 1.0          # s_w[c, w] -> all h
    return jnp.asarray(M), jnp.asarray(E)


def _fold_bn(params, eps=1e-5):
    gamma, beta, mean, var = params
    scale = gamma / jnp.sqrt(var + eps)
    shift = beta - mean * scale
    return scale, shift


def moana_pallas(x, wc, wh, ww, bn_params):
    B, C, H, W = x.shape
    HW = H * W

    s1, b1 = _fold_bn(bn_params[0])
    s2, b2 = _fold_bn(bn_params[1])
    s3, b3 = _fold_bn(bn_params[2])

    # Per-channel params (C, 8): [s1*wc0, s1*wc1, s1*wc2, b1, b2, b3, 0, 0]
    wcv = wc.reshape(3).astype(jnp.float32)
    prm = jnp.stack(
        [s1 * wcv[0], s1 * wcv[1], s1 * wcv[2], b1, b2, b3,
         jnp.zeros_like(s1), jnp.zeros_like(s1)], axis=1).astype(jnp.float32)

    # Fused conv weights (C, 3C) with BN scale folded into the rows.
    # TODO(synk): for very large C, cast these to bf16 to cut the VMEM footprint
    # (kept f32 here for bit-accurate comparison with the f32 reference).
    wh_cat = (jnp.concatenate([wh[:, :, 0], wh[:, :, 1], wh[:, :, 2]], axis=1)
              * s2[:, None]).astype(jnp.float32)
    ww_cat = (jnp.concatenate([ww[:, :, 0], ww[:, :, 1], ww[:, :, 2]], axis=1)
              * s3[:, None]).astype(jnp.float32)

    pool_m, bcast_m = _pool_and_bcast_mats(H, W)

    # Batch-block size: largest divisor of B whose x slab stays ~<= 1 MiB,
    # amortizing per-grid-step overhead without blowing the VMEM budget.
    slab = C * HW * 4
    bt = 1
    for cand in range(B, 0, -1):
        if B % cand == 0 and cand * slab <= (1 << 20):
            bt = cand
            break

    x_flat = x.reshape(B, C, HW).astype(jnp.float32)

    out_flat = pl.pallas_call(
        functools.partial(moana_kernel, H, W),
        out_shape=jax.ShapeDtypeStruct((B, C, HW), jnp.float32),
        grid=(B // bt,),
        in_specs=[
            pl.BlockSpec((bt, C, HW), lambda i: (i, 0, 0)),      # x, lane-dense slab
            pl.BlockSpec((HW, H + W), lambda i: (0, 0)),         # pooling matrix
            pl.BlockSpec((H + W, HW), lambda i: (0, 0)),         # broadcast matrix
            pl.BlockSpec((C, 3 * C), lambda i: (0, 0)),          # conv_h weights (BN folded)
            pl.BlockSpec((C, 3 * C), lambda i: (0, 0)),          # conv_w weights (BN folded)
            pl.BlockSpec((C, 8), lambda i: (0, 0)),              # per-channel params
        ],
        out_specs=pl.BlockSpec((bt, C, HW), lambda i: (i, 0, 0)),
        compiler_params=pltpu.CompilerParams(dimension_semantics=("parallel",)),
    )(x_flat, pool_m, bcast_m, wh_cat, ww_cat, prm)

    return out_flat.reshape(B, C, H, W)


# ---------------------- independent pure-JAX reference --------------------- #
def moana_ref(x, wc, wh, ww, bn_params):
    B, C, H, W = x.shape
    y_c = jnp.mean(x, axis=(2, 3))                  # (B, C)
    y_h = jnp.mean(x, axis=3)                       # (B, C, H)
    y_w = jnp.mean(x, axis=2)                       # (B, C, W)

    def conv1d(inp, w):
        return lax.conv_general_dilated(
            inp, w, window_strides=(1,), padding=((1, 1),),
            dimension_numbers=("NCH", "OIH", "NCH"))

    z_c = conv1d(y_c[:, None, :], wc)[:, 0, :]      # (B, C)
    z_h = conv1d(y_h, wh)                           # (B, C, H)
    z_w = conv1d(y_w, ww)                           # (B, C, W)

    def bn(z, p):
        scale, shift = _fold_bn(p)
        shp = (1, z.shape[1]) + (1,) * (z.ndim - 2)
        return z * scale.reshape(shp) + shift.reshape(shp)

    s_c = jax.nn.sigmoid(bn(z_c, bn_params[0]))
    s_h = jax.nn.sigmoid(bn(z_h, bn_params[1]))
    s_w = jax.nn.sigmoid(bn(z_w, bn_params[2]))
    att = s_c[:, :, None, None] + s_h[:, :, :, None] + s_w[:, :, None, :]
    return x * (1.0 + att)


# ---------------------------------- main ----------------------------------- #
if __name__ == "__main__":
    B, C, H, W = 2, 4, 16, 16
    key = jax.random.PRNGKey(0)
    ks = jax.random.split(key, 8)

    x = jax.random.normal(ks[0], (B, C, H, W), jnp.float32)
    wc = 0.5 * jax.random.normal(ks[1], (1, 1, 3), jnp.float32)                 # conv_c weight
    wh = jax.random.normal(ks[2], (C, C, 3), jnp.float32) / np.sqrt(3.0 * C)    # conv_h weight
    ww = jax.random.normal(ks[3], (C, C, 3), jnp.float32) / np.sqrt(3.0 * C)    # conv_w weight

    def make_bn(k):
        k1, k2, k3, k4 = jax.random.split(k, 4)
        gamma = 1.0 + 0.1 * jax.random.normal(k1, (C,), jnp.float32)
        beta = 0.1 * jax.random.normal(k2, (C,), jnp.float32)
        mean = 0.1 * jax.random.normal(k3, (C,), jnp.float32)
        var = 0.5 + jax.random.uniform(k4, (C,), jnp.float32)
        return (gamma, beta, mean, var)

    bn_params = [make_bn(ks[4]), make_bn(ks[5]), make_bn(ks[6])]   # bn1, bn2, bn3

    out = jax.block_until_ready(moana_pallas(x, wc, wh, ww, bn_params))
    ref = moana_ref(x, wc, wh, ww, bn_params)
    np.testing.assert_allclose(np.asarray(out), np.asarray(ref), rtol=1e-3, atol=1e-3)
    print("KERNEL_OK")
</pallas_src>

<mosaic_0001>
module attributes {stable_mosaic.version = 11 : i64} {
  func.func @moana_kernel(%arg0: i32, %arg1: memref<2x4x256xf32, #tpu.memory_space<vmem>>, %arg2: memref<256x32xf32, #tpu.memory_space<vmem>>, %arg3: memref<32x256xf32, #tpu.memory_space<vmem>>, %arg4: memref<4x12xf32, #tpu.memory_space<vmem>>, %arg5: memref<4x12xf32, #tpu.memory_space<vmem>>, %arg6: memref<4x8xf32, #tpu.memory_space<vmem>>, %arg7: memref<2x4x256xf32, #tpu.memory_space<vmem>>) attributes {dimension_semantics = [#tpu.dimension_semantics<parallel>], iteration_bounds = array<i64: 1>, scalar_prefetch = 0 : i64, scratch_operands = 0 : i64, tpu.core_type = #tpu.core_type<tc>, window_params = [{transform_indices = @transform_0, window_bounds = array<i64: 2, 4, 256>}, {pipeline_mode = #tpu.pipeline_mode<synchronous>, transform_indices = @transform_1, window_bounds = array<i64: 256, 32>}, {pipeline_mode = #tpu.pipeline_mode<synchronous>, transform_indices = @transform_2, window_bounds = array<i64: 32, 256>}, {pipeline_mode = #tpu.pipeline_mode<synchronous>, transform_indices = @transform_3, window_bounds = array<i64: 4, 12>}, {pipeline_mode = #tpu.pipeline_mode<synchronous>, transform_indices = @transform_4, window_bounds = array<i64: 4, 12>}, {pipeline_mode = #tpu.pipeline_mode<synchronous>, transform_indices = @transform_5, window_bounds = array<i64: 4, 8>}, {transform_indices = @transform_6, window_bounds = array<i64: 2, 4, 256>}]} {
    %c0 = arith.constant 0 : index
    %c0_0 = arith.constant 0 : index
    %0 = vector.load %arg6[%c0, %c0_0] : memref<4x8xf32, #tpu.memory_space<vmem>>, vector<4x1xf32>
    %c0_1 = arith.constant 0 : index
    %c1 = arith.constant 1 : index
    %1 = vector.load %arg6[%c0_1, %c1] : memref<4x8xf32, #tpu.memory_space<vmem>>, vector<4x1xf32>
    %c0_2 = arith.constant 0 : index
    %c2 = arith.constant 2 : index
    %2 = vector.load %arg6[%c0_2, %c2] : memref<4x8xf32, #tpu.memory_space<vmem>>, vector<4x1xf32>
    %c0_3 = arith.constant 0 : index
    %c3 = arith.constant 3 : index
    %3 = vector.load %arg6[%c0_3, %c3] : memref<4x8xf32, #tpu.memory_space<vmem>>, vector<4x1xf32>
    %c0_4 = arith.constant 0 : index
    %c4 = arith.constant 4 : index
    %4 = vector.load %arg6[%c0_4, %c4] : memref<4x8xf32, #tpu.memory_space<vmem>>, vector<4x1xf32>
    %c0_5 = arith.constant 0 : index
    %c5 = arith.constant 5 : index
    %5 = vector.load %arg6[%c0_5, %c5] : memref<4x8xf32, #tpu.memory_space<vmem>>, vector<4x1xf32>
    %c0_6 = arith.constant 0 : index
    %c0_7 = arith.constant 0 : index
    %6 = vector.load %arg2[%c0_6, %c0_7] : memref<256x32xf32, #tpu.memory_space<vmem>>, vector<256x32xf32>
    %c0_8 = arith.constant 0 : index
    %c0_9 = arith.constant 0 : index
    %7 = vector.load %arg3[%c0_8, %c0_9] : memref<32x256xf32, #tpu.memory_space<vmem>>, vector<32x256xf32>
    %c0_10 = arith.constant 0 : index
    %c0_11 = arith.constant 0 : index
    %8 = vector.load %arg4[%c0_10, %c0_11] : memref<4x12xf32, #tpu.memory_space<vmem>>, vector<4x12xf32>
    %c0_12 = arith.constant 0 : index
    %c0_13 = arith.constant 0 : index
    %9 = vector.load %arg5[%c0_12, %c0_13] : memref<4x12xf32, #tpu.memory_space<vmem>>, vector<4x12xf32>
    %c0_14 = arith.constant 0 : index
    %c0_15 = arith.constant 0 : index
    %c0_16 = arith.constant 0 : index
    %10 = vector.load %arg1[%c0_14, %c0_15, %c0_16] : memref<2x4x256xf32, #tpu.memory_space<vmem>>, vector<1x4x256xf32>
    %11 = vector.shape_cast %10 : vector<1x4x256xf32> to vector<4x256xf32>
    %cst = arith.constant dense<0.000000e+00> : vector<4x32xf32>
    %12 = tpu.matmul %11, %6, %cst {dimension_numbers = #tpu.dot_dimension_numbers<[1], [0], [0], [1], [0, 0, 1, 1], [], []>} : vector<4x256xf32>, vector<256x32xf32>, vector<4x32xf32> -> vector<4x32xf32>
    %13 = vector.extract_strided_slice %12 {offsets = [0, 0], sizes = [4, 16], strides = [1, 1]} : vector<4x32xf32> to vector<4x16xf32>
    %14 = vector.extract_strided_slice %12 {offsets = [0, 16], sizes = [4, 16], strides = [1, 1]} : vector<4x32xf32> to vector<4x16xf32>
    %cst_17 = arith.constant dense<0.000000e+00> : vector<4xf32>
    %15 = vector.multi_reduction <add>, %13, %cst_17 [1] : vector<4x16xf32> to vector<4xf32>
    %16 = vector.shape_cast %15 : vector<4xf32> to vector<4x1xf32>
    %cst_18 = arith.constant 1.600000e+01 : f32
    %17 = vector.broadcast %cst_18 : f32 to vector<4x1xf32>
    %18 = arith.divf %16, %17 : vector<4x1xf32>
    %cst_19 = arith.constant 0.000000e+00 : f32
    %19 = vector.broadcast %cst_19 : f32 to vector<1x1xf32>
    %20 = vector.extract_strided_slice %18 {offsets = [0, 0], sizes = [3, 1], strides = [1, 1]} : vector<4x1xf32> to vector<3x1xf32>
    %21 = tpu.concatenate %19, %20 in 0 : vector<1x1xf32>, vector<3x1xf32> -> vector<4x1xf32>
    %22 = vector.extract_strided_slice %18 {offsets = [1, 0], sizes = [3, 1], strides = [1, 1]} : vector<4x1xf32> to vector<3x1xf32>
    %23 = tpu.concatenate %22, %19 in 0 : vector<3x1xf32>, vector<1x1xf32> -> vector<4x1xf32>
    %24 = arith.mulf %0, %21 : vector<4x1xf32>
    %25 = arith.mulf %1, %18 : vector<4x1xf32>
    %26 = arith.addf %24, %25 : vector<4x1xf32>
    %27 = arith.mulf %2, %23 : vector<4x1xf32>
    %28 = arith.addf %26, %27 : vector<4x1xf32>
    %29 = arith.addf %28, %3 : vector<4x1xf32>
    %30 = arith.negf %29 : vector<4x1xf32>
    %31 = math.exp %30 : vector<4x1xf32>
    %cst_20 = arith.constant 1.000000e+00 : f32
    %32 = vector.broadcast %cst_20 : f32 to vector<4x1xf32>
    %33 = arith.addf %32, %31 : vector<4x1xf32>
    %34 = arith.divf %32, %33 : vector<4x1xf32>
    %cst_21 = arith.constant 0.000000e+00 : f32
    %35 = vector.broadcast %cst_21 : f32 to vector<4x1xf32>
    %36 = vector.extract_strided_slice %13 {offsets = [0, 0], sizes = [4, 15], strides = [1, 1]} : vector<4x16xf32> to vector<4x15xf32>
    %37 = tpu.concatenate %35, %36 in 1 : vector<4x1xf32>, vector<4x15xf32> -> vector<4x16xf32>
    %38 = vector.extract_strided_slice %13 {offsets = [0, 1], sizes = [4, 15], strides = [1, 1]} : vector<4x16xf32> to vector<4x15xf32>
    %39 = tpu.concatenate %38, %35 in 1 : vector<4x15xf32>, vector<4x1xf32> -> vector<4x16xf32>
    %40 = tpu.concatenate %37, %13, %39 in 0 : vector<4x16xf32>, vector<4x16xf32>, vector<4x16xf32> -> vector<12x16xf32>
    %cst_22 = arith.constant dense<0.000000e+00> : vector<4x16xf32>
    %41 = tpu.matmul %8, %40, %cst_22 {dimension_numbers = #tpu.dot_dimension_numbers<[1], [0], [0], [1], [0, 0, 1, 1], [], []>} : vector<4x12xf32>, vector<12x16xf32>, vector<4x16xf32> -> vector<4x16xf32>
    %42 = vector.broadcast %4 : vector<4x1xf32> to vector<4x16xf32>
    %43 = arith.addf %41, %42 : vector<4x16xf32>
    %44 = arith.negf %43 : vector<4x16xf32>
    %45 = math.exp %44 : vector<4x16xf32>
    %cst_23 = arith.constant 1.000000e+00 : f32
    %46 = vector.broadcast %cst_23 : f32 to vector<4x16xf32>
    %47 = arith.addf %46, %45 : vector<4x16xf32>
    %48 = arith.divf %46, %47 : vector<4x16xf32>
    %49 = vector.broadcast %34 : vector<4x1xf32> to vector<4x16xf32>
    %50 = arith.addf %48, %49 : vector<4x16xf32>
    %51 = vector.extract_strided_slice %14 {offsets = [0, 0], sizes = [4, 15], strides = [1, 1]} : vector<4x16xf32> to vector<4x15xf32>
    %52 = tpu.concatenate %35, %51 in 1 : vector<4x1xf32>, vector<4x15xf32> -> vector<4x16xf32>
    %53 = vector.extract_strided_slice %14 {offsets = [0, 1], sizes = [4, 15], strides = [1, 1]} : vector<4x16xf32> to vector<4x15xf32>
    %54 = tpu.concatenate %53, %35 in 1 : vector<4x15xf32>, vector<4x1xf32> -> vector<4x16xf32>
    %55 = tpu.concatenate %52, %14, %54 in 0 : vector<4x16xf32>, vector<4x16xf32>, vector<4x16xf32> -> vector<12x16xf32>
    %cst_24 = arith.constant dense<0.000000e+00> : vector<4x16xf32>
    %56 = tpu.matmul %9, %55, %cst_24 {dimension_numbers = #tpu.dot_dimension_numbers<[1], [0], [0], [1], [0, 0, 1, 1], [], []>} : vector<4x12xf32>, vector<12x16xf32>, vector<4x16xf32> -> vector<4x16xf32>
    %57 = vector.broadcast %5 : vector<4x1xf32> to vector<4x16xf32>
    %58 = arith.addf %56, %57 : vector<4x16xf32>
    %59 = arith.negf %58 : vector<4x16xf32>
    %60 = math.exp %59 : vector<4x16xf32>
    %cst_25 = arith.constant 1.000000e+00 : f32
    %61 = vector.broadcast %cst_25 : f32 to vector<4x16xf32>
    %62 = arith.addf %61, %60 : vector<4x16xf32>
    %63 = arith.divf %61, %62 : vector<4x16xf32>
    %64 = tpu.concatenate %50, %63 in 1 : vector<4x16xf32>, vector<4x16xf32> -> vector<4x32xf32>
    %cst_26 = arith.constant dense<0.000000e+00> : vector<4x256xf32>
    %65 = tpu.matmul %64, %7, %cst_26 {dimension_numbers = #tpu.dot_dimension_numbers<[1], [0], [0], [1], [0, 0, 1, 1], [], []>} : vector<4x32xf32>, vector<32x256xf32>, vector<4x256xf32> -> vector<4x256xf32>
    %cst_27 = arith.constant 1.000000e+00 : f32
    %66 = vector.broadcast %cst_27 : f32 to vector<4x256xf32>
    %67 = arith.addf %66, %65 : vector<4x256xf32>
    %68 = arith.mulf %11, %67 : vector<4x256xf32>
    %c0_28 = arith.constant 0 : index
    %c0_29 = arith.constant 0 : index
    %c0_30 = arith.constant 0 : index
    %69 = vector.load %arg7[%c0_28, %c0_29, %c0_30] : memref<2x4x256xf32, #tpu.memory_space<vmem>>, vector<1x4x256xf32>
    %70 = vector.shape_cast %69 : vector<1x4x256xf32> to vector<4x256xf32>
    %71 = vector.shape_cast %68 : vector<4x256xf32> to vector<1x4x256xf32>
    tpu.vector_store %arg7[%c0_28, %c0_29, %c0_30], %71 {strides = array<i32>} : memref<2x4x256xf32, #tpu.memory_space<vmem>>, vector<1x4x256xf32>,
    %c1_31 = arith.constant 1 : index
    %c0_32 = arith.constant 0 : index
    %c0_33 = arith.constant 0 : index
    %72 = vector.load %arg1[%c1_31, %c0_32, %c0_33] : memref<2x4x256xf32, #tpu.memory_space<vmem>>, vector<1x4x256xf32>
    %73 = vector.shape_cast %72 : vector<1x4x256xf32> to vector<4x256xf32>
    %cst_34 = arith.constant dense<0.000000e+00> : vector<4x32xf32>
    %74 = tpu.matmul %73, %6, %cst_34 {dimension_numbers = #tpu.dot_dimension_numbers<[1], [0], [0], [1], [0, 0, 1, 1], [], []>} : vector<4x256xf32>, vector<256x32xf32>, vector<4x32xf32> -> vector<4x32xf32>
    %75 = vector.extract_strided_slice %74 {offsets = [0, 0], sizes = [4, 16], strides = [1, 1]} : vector<4x32xf32> to vector<4x16xf32>
    %76 = vector.extract_strided_slice %74 {offsets = [0, 16], sizes = [4, 16], strides = [1, 1]} : vector<4x32xf32> to vector<4x16xf32>
    %cst_35 = arith.constant dense<0.000000e+00> : vector<4xf32>
    %77 = vector.multi_reduction <add>, %75, %cst_35 [1] : vector<4x16xf32> to vector<4xf32>
    %78 = vector.shape_cast %77 : vector<4xf32> to vector<4x1xf32>
    %cst_36 = arith.constant 1.600000e+01 : f32
    %79 = vector.broadcast %cst_36 : f32 to vector<4x1xf32>
    %80 = arith.divf %78, %79 : vector<4x1xf32>
    %cst_37 = arith.constant 0.000000e+00 : f32
    %81 = vector.broadcast %cst_37 : f32 to vector<1x1xf32>
    %82 = vector.extract_strided_slice %80 {offsets = [0, 0], sizes = [3, 1], strides = [1, 1]} : vector<4x1xf32> to vector<3x1xf32>
    %83 = tpu.concatenate %81, %82 in 0 : vector<1x1xf32>, vector<3x1xf32> -> vector<4x1xf32>
    %84 = vector.extract_strided_slice %80 {offsets = [1, 0], sizes = [3, 1], strides = [1, 1]} : vector<4x1xf32> to vector<3x1xf32>
    %85 = tpu.concatenate %84, %81 in 0 : vector<3x1xf32>, vector<1x1xf32> -> vector<4x1xf32>
    %86 = arith.mulf %0, %83 : vector<4x1xf32>
    %87 = arith.mulf %1, %80 : vector<4x1xf32>
    %88 = arith.addf %86, %87 : vector<4x1xf32>
    %89 = arith.mulf %2, %85 : vector<4x1xf32>
    %90 = arith.addf %88, %89 : vector<4x1xf32>
    %91 = arith.addf %90, %3 : vector<4x1xf32>
    %92 = arith.negf %91 : vector<4x1xf32>
    %93 = math.exp %92 : vector<4x1xf32>
    %cst_38 = arith.constant 1.000000e+00 : f32
    %94 = vector.broadcast %cst_38 : f32 to vector<4x1xf32>
    %95 = arith.addf %94, %93 : vector<4x1xf32>
    %96 = arith.divf %94, %95 : vector<4x1xf32>
    %cst_39 = arith.constant 0.000000e+00 : f32
    %97 = vector.broadcast %cst_39 : f32 to vector<4x1xf32>
    %98 = vector.extract_strided_slice %75 {offsets = [0, 0], sizes = [4, 15], strides = [1, 1]} : vector<4x16xf32> to vector<4x15xf32>
    %99 = tpu.concatenate %97, %98 in 1 : vector<4x1xf32>, vector<4x15xf32> -> vector<4x16xf32>
    %100 = vector.extract_strided_slice %75 {offsets = [0, 1], sizes = [4, 15], strides = [1, 1]} : vector<4x16xf32> to vector<4x15xf32>
    %101 = tpu.concatenate %100, %97 in 1 : vector<4x15xf32>, vector<4x1xf32> -> vector<4x16xf32>
    %102 = tpu.concatenate %99, %75, %101 in 0 : vector<4x16xf32>, vector<4x16xf32>, vector<4x16xf32> -> vector<12x16xf32>
    %cst_40 = arith.constant dense<0.000000e+00> : vector<4x16xf32>
    %103 = tpu.matmul %8, %102, %cst_40 {dimension_numbers = #tpu.dot_dimension_numbers<[1], [0], [0], [1], [0, 0, 1, 1], [], []>} : vector<4x12xf32>, vector<12x16xf32>, vector<4x16xf32> -> vector<4x16xf32>
    %104 = vector.broadcast %4 : vector<4x1xf32> to vector<4x16xf32>
    %105 = arith.addf %103, %104 : vector<4x16xf32>
    %106 = arith.negf %105 : vector<4x16xf32>
    %107 = math.exp %106 : vector<4x16xf32>
    %cst_41 = arith.constant 1.000000e+00 : f32
    %108 = vector.broadcast %cst_41 : f32 to vector<4x16xf32>
    %109 = arith.addf %108, %107 : vector<4x16xf32>
    %110 = arith.divf %108, %109 : vector<4x16xf32>
    %111 = vector.broadcast %96 : vector<4x1xf32> to vector<4x16xf32>
    %112 = arith.addf %110, %111 : vector<4x16xf32>
    %113 = vector.extract_strided_slice %76 {offsets = [0, 0], sizes = [4, 15], strides = [1, 1]} : vector<4x16xf32> to vector<4x15xf32>
    %114 = tpu.concatenate %97, %113 in 1 : vector<4x1xf32>, vector<4x15xf32> -> vector<4x16xf32>
    %115 = vector.extract_strided_slice %76 {offsets = [0, 1], sizes = [4, 15], strides = [1, 1]} : vector<4x16xf32> to vector<4x15xf32>
    %116 = tpu.concatenate %115, %97 in 1 : vector<4x15xf32>, vector<4x1xf32> -> vector<4x16xf32>
    %117 = tpu.concatenate %114, %76, %116 in 0 : vector<4x16xf32>, vector<4x16xf32>, vector<4x16xf32> -> vector<12x16xf32>
    %cst_42 = arith.constant dense<0.000000e+00> : vector<4x16xf32>
    %118 = tpu.matmul %9, %117, %cst_42 {dimension_numbers = #tpu.dot_dimension_numbers<[1], [0], [0], [1], [0, 0, 1, 1], [], []>} : vector<4x12xf32>, vector<12x16xf32>, vector<4x16xf32> -> vector<4x16xf32>
    %119 = vector.broadcast %5 : vector<4x1xf32> to vector<4x16xf32>
    %120 = arith.addf %118, %119 : vector<4x16xf32>
    %121 = arith.negf %120 : vector<4x16xf32>
    %122 = math.exp %121 : vector<4x16xf32>
    %cst_43 = arith.constant 1.000000e+00 : f32
    %123 = vector.broadcast %cst_43 : f32 to vector<4x16xf32>
    %124 = arith.addf %123, %122 : vector<4x16xf32>
    %125 = arith.divf %123, %124 : vector<4x16xf32>
    %126 = tpu.concatenate %112, %125 in 1 : vector<4x16xf32>, vector<4x16xf32> -> vector<4x32xf32>
    %cst_44 = arith.constant dense<0.000000e+00> : vector<4x256xf32>
    %127 = tpu.matmul %126, %7, %cst_44 {dimension_numbers = #tpu.dot_dimension_numbers<[1], [0], [0], [1], [0, 0, 1, 1], [], []>} : vector<4x32xf32>, vector<32x256xf32>, vector<4x256xf32> -> vector<4x256xf32>
    %cst_45 = arith.constant 1.000000e+00 : f32
    %128 = vector.broadcast %cst_45 : f32 to vector<4x256xf32>
    %129 = arith.addf %128, %127 : vector<4x256xf32>
    %130 = arith.mulf %73, %129 : vector<4x256xf32>
    %c1_46 = arith.constant 1 : index
    %c0_47 = arith.constant 0 : index
    %c0_48 = arith.constant 0 : index
    %131 = vector.load %arg7[%c1_46, %c0_47, %c0_48] : memref<2x4x256xf32, #tpu.memory_space<vmem>>, vector<1x4x256xf32>
    %132 = vector.shape_cast %131 : vector<1x4x256xf32> to vector<4x256xf32>
    %133 = vector.shape_cast %130 : vector<4x256xf32> to vector<1x4x256xf32>
    tpu.vector_store %arg7[%c1_46, %c0_47, %c0_48], %133 {strides = array<i32>} : memref<2x4x256xf32, #tpu.memory_space<vmem>>, vector<1x4x256xf32>,
    return
  }
  func.func @transform_0(%arg0: i32) -> (i32, i32, i32) {
    %c0_i32 = arith.constant 0 : i32
    %c0_i32_0 = arith.constant 0 : i32
    %c0_i32_1 = arith.constant 0 : i32
    return %arg0, %c0_i32, %c0_i32_0 : i32, i32, i32
  }
  func.func @transform_1(%arg0: i32) -> (i32, i32) {
    %c0_i32 = arith.constant 0 : i32
    %c0_i32_0 = arith.constant 0 : i32
    %c0_i32_1 = arith.constant 0 : i32
    return %c0_i32, %c0_i32_0 : i32, i32
  }
  func.func @transform_2(%arg0: i32) -> (i32, i32) {
    %c0_i32 = arith.constant 0 : i32
    %c0_i32_0 = arith.constant 0 : i32
    %c0_i32_1 = arith.constant 0 : i32
    return %c0_i32, %c0_i32_0 : i32, i32
  }
  func.func @transform_3(%arg0: i32) -> (i32, i32) {
    %c0_i32 = arith.constant 0 : i32
    %c0_i32_0 = arith.constant 0 : i32
    %c0_i32_1 = arith.constant 0 : i32
    return %c0_i32, %c0_i32_0 : i32, i32
  }
  func.func @transform_4(%arg0: i32) -> (i32, i32) {
    %c0_i32 = arith.constant 0 : i32
    %c0_i32_0 = arith.constant 0 : i32
    %c0_i32_1 = arith.constant 0 : i32
    return %c0_i32, %c0_i32_0 : i32, i32
  }
  func.func @transform_5(%arg0: i32) -> (i32, i32) {
    %c0_i32 = arith.constant 0 : i32
    %c0_i32_0 = arith.constant 0 : i32
    %c0_i32_1 = arith.constant 0 : i32
    return %c0_i32, %c0_i32_0 : i32, i32
  }
  func.func @transform_6(%arg0: i32) -> (i32, i32, i32) {
    %c0_i32 = arith.constant 0 : i32
    %c0_i32_0 = arith.constant 0 : i32
    %c0_i32_1 = arith.constant 0 : i32
    return %arg0, %c0_i32, %c0_i32_0 : i32, i32, i32
  }
}

</mosaic_0001>

<bundles_post_ra>
// kernel: tpu_custom_call.1
= control target key start
LH: loop header
LB: loop body
LE: loop exit
PB: predicated region body
PF: predicated region fallthrough
CT: control target
= control target key end

     0   :  { %s1185_s0 = inlined_call_operand.vmem [shape: f32[2,4,256], index: 0, kind: input, shape index: {}]   ;;  %s1186_s1 = inlined_call_operand.vmem [shape: f32[256,32], index: 1, kind: input, shape index: {}]   ;;  %s1187_s2 = inlined_call_operand.vmem [shape: f32[32,256], index: 2, kind: input, shape index: {}]   ;;  %s1188_s3 = inlined_call_operand.vmem [shape: f32[4,12], index: 3, kind: input, shape index: {}]   ;;  %s1189_s4 = inlined_call_operand.vmem [shape: f32[4,12], index: 4, kind: input, shape index: {}]   ;;  %s1190_s5 = inlined_call_operand.vmem [shape: f32[4,8], index: 5, kind: input, shape index: {}]   ;;  %s1191_s6 = inlined_call_operand.hbm [shape: f32[2,4,256], index: 6, kind: output, shape index: {}]  }
   0x1   :  { %v795_v0 = vld [vmem:[%s1186_s1 + $0x78] sm:$0xff]  ;;  %v805_v2 = vld [vmem:[%s1186_s1 + $0x70] sm:$0xff]  ;;  %v817_v4 = vld [vmem:[%s1186_s1 + $0x68] sm:$0xff] }
   0x2   :  { %v800_v1 = vld [vmem:[%s1186_s1 + $0xf8] sm:$0xff]  ;;  %74 = vmatpush.msra.mxu0 %v795_v0  ;;  %v812_v3 = vld [vmem:[%s1186_s1 + $0xf0] sm:$0xff]  ;;  %v822_v5 = vld [vmem:[%s1186_s1 + $0xe8] sm:$0xff] }
   0x3   :  { %94 = vmatpush.msra.mxu1 %v800_v1  ;;  %v829_v6 = vld [vmem:[%s1186_s1 + $0x60] sm:$0xff]  ;;  %v841_v8 = vld [vmem:[%s1186_s1 + $0x58] sm:$0xff]  ;;  %v853_v10 = vld [vmem:[%s1186_s1 + $0x50] sm:$0xff] }
   0x4   :  { %75 = vmatpush.msra.mxu0 %v805_v2  ;;  %v834_v7 = vld [vmem:[%s1186_s1 + $0xe0] sm:$0xff]  ;;  %v846_v9 = vld [vmem:[%s1186_s1 + $0xd8] sm:$0xff]  ;;  %v858_v11 = vld [vmem:[%s1186_s1 + $0xd0] sm:$0xff] }
   0x5   :  { %95 = vmatpush.msra.mxu1 %v812_v3  ;;  %v865_v12 = vld [vmem:[%s1186_s1 + $0x48] sm:$0xff]  ;;  %v875_v14 = vld [vmem:[%s1185_s0] sm:$0xff] }
   0x6   :  { %76 = vmatpush.msra.mxu0 %v817_v4  ;;  %v870_v13 = vld [vmem:[%s1186_s1 + $0xc8] sm:$0xff]  ;;  %69 = vst [vmem:[#allocation1] ss:$2 sm:$0xff] %v875_v14 }
   0x7   :  { %96 = vmatpush.msra.mxu1 %v822_v5 }
   0x8   :  { %77 = vmatpush.msra.mxu0 %v829_v6 }
   0x9   :  { %97 = vmatpush.msra.mxu1 %v834_v7 }
   0xa   :  { %78 = vmatpush.msra.mxu0 %v841_v8 }
   0xb   :  { %98 = vmatpush.msra.mxu1 %v846_v9 }
   0xc   :  { %79 = vmatpush.msra.mxu0 %v853_v10 }
   0xd   :  { %99 = vmatpush.msra.mxu1 %v858_v11 }
   0xe   :  { %11 = vsyncpa [#allocation3], 0  ;;  %v883_v15 = vld [vmem:[%s1186_s1 + $0x40] sm:$0xff]  ;;  %80 = vmatpush.msra.mxu0 %v865_v12  ;;  %v895_v17 = vld [vmem:[%s1186_s1 + $0x38] sm:$0xff]  ;;  %s741_s16 = smov 1   ;;  %s742_s17 = smov 111  }
   0xf   :  { %v888_v16 = vld [vmem:[%s1186_s1 + $0xc0] sm:$0xff]  ;;  %100 = vmatpush.msra.mxu1 %v870_v13  ;;  %v900_v18 = vld [vmem:[%s1186_s1 + $0xb8] sm:$0xff]  ;;  %v907_v19 = vld [vmem:[%s1186_s1 + $0x30] sm:$0xff]  ;;  %s744_s18 = smov 113   ;;  %s745_s19 = smov 127   ;;  %vm114_vm0 = vcmask 125952  }
  0x10   :  { %81 = vmatpush.msra.mxu0 %v883_v15  ;;  %v912_v20 = vld [vmem:[%s1186_s1 + $0xb0] sm:$0xff]  ;;  %v917_v21 = vld [vmem:[%s1185_s0 + $0x8] sm:$0xff]  ;;  %v70_v24 = vld.sshfl [vmem:[#allocation1] sm:$0xff pattern:$0x75316420]  ;;  %vm185_vm1 = vcmask 121856  }
  0x11   :  { %101 = vmatpush.msra.mxu1 %v888_v16  ;;  %v924_v22 = vld [vmem:[%s1186_s1 + $0x28] sm:$0xff]  ;;  %v937_v26 = vld [vmem:[%s1186_s1 + $0x20] sm:$0xff]  ;;  %v949_v28 = vld [vmem:[%s1186_s1 + $0x18] sm:$0xff]  ;;  %vm189_vm2 = vcmask 1043456   ;;  %vm180_vm3 = vcmask 7168   ;;  %v746_v52 = vmov 16.0  }
  0x12   :  { %82 = vmatpush.msra.mxu0 %v895_v17  ;;  %v929_v23 = vld [vmem:[%s1186_s1 + $0xa8] sm:$0xff]  ;;  %v942_v27 = vld [vmem:[%s1186_s1 + $0xa0] sm:$0xff]  ;;  %v954_v29 = vld [vmem:[%s1186_s1 + $0x98] sm:$0xff]  ;;  %689 = vrcp.f32 %v746_v52  ;;  %vm195_vm4 = vcmask 97280   ;;  %vm133_vm6 = vcmask 1042432   ;;  %s748_s23 = smov 125  }
  0x13   :  { %102 = vmatpush.msra.mxu1 %v900_v18  ;;  %v71_v25 = vld.sshfl [vmem:[#allocation1 + $0x8] sm:$0xff pattern:$0x75316420]  ;;  %v961_v30 = vld [vmem:[%s1186_s1 + $0x10] sm:$0xff]  ;;  %v985_v34 = vld [vmem:[%s1186_s1] sm:$0xff]  ;;  %s751_s25 = smov 126  }
  0x14   :  { %83 = vmatpush.msra.mxu0 %v907_v19  ;;  %368 = vst [vmem:[#allocation1] ss:$2 sm:$0xff] %v917_v21  ;;  %v966_v31 = vld [vmem:[%s1186_s1 + $0x90] sm:$0xff]  ;;  %v973_v32 = vld [vmem:[%s1186_s1 + $0x8] sm:$0xff]  ;;  %v990_v35 = vld [vmem:[%s1186_s1 + $0x80] sm:$0xff]  ;;  %vm129_vm7 = vcmask 1040384  }
  0x15   :  { %103 = vmatpush.msra.mxu1 %v912_v20  ;;  %v978_v33 = vld [vmem:[%s1186_s1 + $0x88] sm:$0xff]  ;;  %s743_s1 = smov 112   ;;  %v1013_v53 = vld [vmem:[%s1189_s4] sm:$0xf]  ;;  %s747_s4 = smov 2  }
  0x16   :  { %84 = vmatpush.msra.mxu0 %v924_v22  ;;  %v1022_v61 = vld [vmem:[%s1190_s5] sm:$0xf]  ;;  %s755_s0 = smov 128   ;;  %s756_s21 = smov 8  }
  0x17   :  { %104 = vmatpush.msra.mxu1 %v929_v23 }
  0x18   :  { %85 = vmatpush.msra.mxu0 %v937_v26  ;;  %v690_v54 = vpop.eup %689 }
  0x19   :  { %105 = vmatpush.msra.mxu1 %v942_v27  ;;  %v119_v55 = vmul.f32 16.0, %v690_v54  ;;  %vm123_vm5 = vweird.f32 %v690_v54 }
  0x1a   :  { %86 = vmatpush.msra.mxu0 %v949_v28 }
  0x1b   :  { %106 = vmatpush.msra.mxu1 %v954_v29  ;;  %v120_v56 = vsub.f32 1.0, %v119_v55  ;;  %v1054_v55 = vld [vmem:[%s1187_s2 + $0x38] sm:$0xff] }
  0x1c   :  { %87 = vmatpush.msra.mxu0 %v961_v30 }
  0x1d   :  { %107 = vmatpush.msra.mxu1 %v966_v31  ;;  %v121_v57 = vmul.f32 %v690_v54, %v120_v56  ;;  %v1059_v56 = vld [vmem:[%s1187_s2 + $0x20] sm:$0xff] }
  0x1e   :  { %88 = vmatpush.msra.mxu0 %v973_v32 }
  0x1f   :  { %108 = vmatpush.msra.mxu1 %v978_v33  ;;  %v122_v58 = vadd.f32 %v690_v54, %v121_v57 }
  0x20   :  { %89 = vmatpush.msra.mxu0 %v985_v34 }
  0x21   :  { %109 = vmatpush.msra.mxu1 %v990_v35  ;;  %90 = vmatmul.f32.vlgmr.msra.gmra.mxu0 %v70_v24  ;;  %v1017_v59 = vsel %vm123_vm5, %v690_v54, %v122_v58  ;;  %v1049_v54 = vld [vmem:[%s1187_s2 + $0x30] sm:$0xff]  ;;  %v1068_v58 = vld [vmem:[%s1187_s2 + $0x28] sm:$0xff] }
  0x22   :  { %110 = vmatmul.f32.vlgmr.msra.gmra.mxu1 %v71_v25 }
  0x9e   :  { %v91_v36 = vpop.f32.mrf.mxu0 }
  0x9f   :  { %v111_v37 = vpop.f32.mrf.mxu1 }
  0xa0   :  { %v112_v38 = vadd.f32 %v111_v37, %v91_v36  ;;  %v749_v36 = vmov 5   ;;  %v1033_v37 = vld [vmem:[%s1188_s3] sm:$0xf] }
  0xa1   :  { %684 = vset.pattern.permute.xlu0 %v749_v36  ;;  %v1091_v36 = vld [vmem:[%s1187_s2 + $0x8] sm:$0xff] }
  0xa2   :  { %177 = vrot.lane.b32.xlu2 %v112_v38, %s741_s16  ;;  %251 = vrot.lane.b32.xlu0 %v112_v38, %s742_s17  ;;  %v187_v39 = vrot.slane %v112_v38, 4  ;;  %v115_v40 = vsel %vm114_vm0, %v112_v38, 0.0 }
  0xa4   :  { %255 = vrot.lane.b32.xlu1 %v187_v39, %s743_s1 }
  0xaa   :  { %247 = vrot.lane.b32.xlu0 %v112_v38, %s744_s18 }
  0xac   :  { %182 = vrot.lane.b32.xlu1 %v112_v38, %s745_s19  ;;  %v750_v38 = vmov 4  }
  0xad   :  { %685 = vset.pattern.permute.xlu1 %v750_v38 }
  0xcb   :  { %116 = vadd.xlane.f32.xlu2 %v115_v40 }
  0xfc   :  { %v178_v44 = vpop.permute.xlu2 %177 }
  0xfd   :  { %v181_v47 = vsel %vm180_vm3, 0.0, %v178_v44 }
  0xfe   :  { %v190_v51 = vsel %vm189_vm2, %v181_v47, %v187_v39 }
 0x114   :  { %v252_v41 = vpop.permute.xlu0 %251 }
 0x115   :  { %v254_v42 = vsel %vm185_vm1, %v252_v41, 0.0 }
 0x116   :  { %653 = vmatpush.msk.msra.mxu3 %vm189_vm2, %v254_v42  ;;  %v256_v43 = vpop.permute.xlu1 %255  ;;  %v752_v42 = vmov 0  }
 0x117   :  { %687 = vset.pattern.permute.xlu2 %v752_v42 }
 0x11c   :  { %v248_v45 = vpop.permute.xlu0 %247 }
 0x11d   :  { %v250_v46 = vsel %vm180_vm3, 0.0, %v248_v45 }
 0x11e   :  { %v183_v48 = vpop.permute.xlu1 %182  ;;  %v258_v49 = vsel %vm189_vm2, %v250_v46, %v256_v43 }
 0x11f   :  { %284 = vmatpush.msra.mxu3 %v258_v49  ;;  %v186_v50 = vsel %vm185_vm1, %v183_v48, 0.0 }
 0x120   :  { %650 = vmatpush.msk.msra.mxu2 %vm189_vm2, %v186_v50  ;;  %654 = vmatmul.msk.f32.vlgmr.msra.gmra.mxu3 %vm195_vm4, %v1013_v53 }
 0x121   :  { %350 = vmatpush.msrb.mxu3 %v1054_v55 }
 0x122   :  { %217 = vmatpush.msra.mxu2 %v190_v51 }
 0x123   :  { %651 = vmatmul.msk.f32.vlgmr.msra.gmra.mxu2 %vm195_vm4, %v1033_v37  ;;  %351 = vmatpush.msrb.mxu3 %v1068_v58 }
 0x124   :  { %330 = vmatpush.msrb.mxu2 %v1049_v54 }
 0x126   :  { %331 = vmatpush.msrb.mxu2 %v1059_v56 }
 0x13e   :  { %v117_v60 = vpop.xlane.xlu2 %116 }
 0x13f   :  { %v125_v62 = vmul.f32 %v1017_v59, %v117_v60 }
 0x141   :  { %v136_v63 = vmul.f32 %v125_v62, %v1022_v61  ;;  %v131_v24 = vrot.slane %v125_v62, 1  ;;  %v127_v41 = vrot.slane %v125_v62, 7  ;;  %v1074_v62 = vld [vmem:[%s1187_s2 + $0x10] sm:$0xff] }
 0x142   :  { %332 = vmatpush.msrb.mxu2 %v1074_v62 }
 0x143   :  { %138 = vrot.lane.b32.xlu1 %v136_v63, %s745_s19  ;;  %v134_v25 = vsel %vm133_vm6, %v131_v24, 0.0  ;;  %v130_v44 = vsel %vm129_vm7, 0.0, %v127_v41  ;;  %v1079_v63 = vld [vmem:[%s1187_s2 + $0x18] sm:$0xff] }
 0x144   :  { %143 = vrot.lane.b32.xlu0 %v134_v25, %s747_s4  ;;  %v135_v45 = vmul.f32 %v130_v44, %v1022_v61  ;;  %v1086_v25 = vld [vmem:[%s1187_s2] sm:$0xff]  ;;  %352 = vmatpush.msrb.mxu3 %v1079_v63  ;;  %s753_s2 = smov 16  }
 0x145   :  { %333 = vmatpush.msrb.mxu2 %v1086_v25 }
 0x146   :  { %353 = vmatpush.msrb.mxu3 %v1091_v36 }
 0x147   :  { %373 = vmatpush.msra.mxu2 %v795_v0 }
 0x148   :  { %393 = vmatpush.msra.mxu3 %v800_v1 }
 0x149   :  { %374 = vmatpush.msra.mxu2 %v805_v2 }
 0x14a   :  { %394 = vmatpush.msra.mxu3 %v812_v3 }
 0x14b   :  { %153 = vrot.lane.b32.xlu1 %v1022_v61, %s748_s23  ;;  %375 = vmatpush.msra.mxu2 %v817_v4 }
 0x14c   :  { %395 = vmatpush.msra.mxu3 %v822_v5 }
 0x14d   :  { %376 = vmatpush.msra.mxu2 %v829_v6 }
 0x14e   :  { %396 = vmatpush.msra.mxu3 %v834_v7 }
 0x14f   :  { %377 = vmatpush.msra.mxu2 %v841_v8 }
 0x150   :  { %397 = vmatpush.msra.mxu3 %v846_v9 }
 0x151   :  { %378 = vmatpush.msra.mxu2 %v853_v10 }
 0x152   :  { %398 = vmatpush.msra.mxu3 %v858_v11 }
 0x153   :  { %192 = vperm.xlu1 %685, %v1022_v61   ;;  %379 = vmatpush.msra.mxu2 %v865_v12 }
 0x154   :  { %399 = vmatpush.msra.mxu3 %v870_v13 }
 0x155   :  { %380 = vmatpush.msra.mxu2 %v883_v15 }
 0x156   :  { %400 = vmatpush.msra.mxu3 %v888_v16 }
 0x157   :  { %381 = vmatpush.msra.mxu2 %v895_v17 }
 0x158   :  { %401 = vmatpush.msra.mxu3 %v900_v18 }
 0x159   :  { %382 = vmatpush.msra.mxu2 %v907_v19 }
 0x15a   :  { %402 = vmatpush.msra.mxu3 %v912_v20 }
 0x15b   :  { %686 = vset.pattern.permute.xlu1 %v752_v42  ;;  %383 = vmatpush.msra.mxu2 %v924_v22 }
 0x15c   :  { %403 = vmatpush.msra.mxu3 %v929_v23 }
 0x15d   :  { %384 = vmatpush.msra.mxu2 %v937_v26 }
 0x15e   :  { %404 = vmatpush.msra.mxu3 %v942_v27 }
 0x15f   :  { %385 = vmatpush.msra.mxu2 %v949_v28 }
 0x160   :  { %405 = vmatpush.msra.mxu3 %v954_v29 }
 0x161   :  { %386 = vmatpush.msra.mxu2 %v961_v30 }
 0x162   :  { %406 = vmatpush.msra.mxu3 %v966_v31 }
 0x163   :  { %387 = vmatpush.msra.mxu2 %v973_v32 }
 0x164   :  { %407 = vmatpush.msra.mxu3 %v978_v33 }
 0x165   :  { %388 = vmatpush.msra.mxu2 %v985_v34 }
 0x166   :  { %408 = vmatpush.msra.mxu3 %v990_v35 }
 0x1a3   :  { %v286_v52 = vpop.f32.mrf.mxu3 }
 0x1a6   :  { %v219_v19 = vpop.f32.mrf.mxu2 }
 0x1b5   :  { %v139_v43 = vpop.permute.xlu1 %138 }
 0x1b6   :  { %v144_v39 = vpop.permute.xlu0 %143  ;;  %v141_v46 = vadd.f32 %v139_v43, %v135_v45 }
 0x1b7   :  { %v146_v40 = vmul.f32 %v144_v39, %v1022_v61 }
 0x1b9   :  { %148 = vrot.lane.b32.xlu0 %v146_v40, %s751_s25 }
 0x1bd   :  { %v1043_v48 = vpop.permute.xlu1 %153 }
 0x1c1   :  { %260 = vperm.xlu0 %684, %v1022_v61  }
 0x1c5   :  { %v1130_v20 = vpop.permute.xlu1 %192 }
 0x1c6   :  { %v220_v22 = vadd.f32 %v219_v19, %v1130_v20 }
 0x1c8   :  { %v652_v23 = vmul.f32 -1.442695, %v220_v22 }
 0x1c9   :  { %688 = vset.pattern.permute.xlu0 %v752_v42 }
 0x22b   :  { %v149_v47 = vpop.permute.xlu0 %148 }
 0x22c   :  { %v151_v49 = vadd.f32 %v149_v47, %v141_v46 }
 0x22e   :  { %v156_v50 = vadd.f32 %v1043_v48, %v151_v49 }
 0x230   :  { %v649_v51 = vmul.f32 -1.442695, %v156_v50 }
 0x232   :  { %691 = vpow2.f32 %v649_v51  ;;  %v369_v51 = vld.sshfl [vmem:[#allocation1] sm:$0xff pattern:$0x75316420] }
 0x233   :  { %v1061_v57 = vpop.permute.xlu0 %260 }
 0x234   :  { %v287_v60 = vadd.f32 %v286_v52, %v1061_v57  ;;  %v370_v52 = vld.sshfl [vmem:[#allocation1 + $0x8] sm:$0xff pattern:$0x75316420] }
 0x236   :  { %v655_v24 = vmul.f32 -1.442695, %v287_v60 }
 0x238   :  { %v692_v38 = vpop.eup %691  ;;  %693 = vpow2.f32 %v655_v24 }
 0x239   :  { %v160_v39 = vadd.f32 1.0, %v692_v38 }
 0x23b   :  { %695 = vrcp.f32 %v160_v39  ;;  %v172_v2 = vand.u32 2147483648, %v160_v39  ;;  %v170_v4 = vand.u32 2147483647, %v160_v39  ;;  %vm166_vm9 = vweird.f32 %v160_v39 }
 0x23d   :  { %v173_v8 = vor.u32 1.1754944e-38, %v172_v2  ;;  %vm171_vm11 = vcmp.eq.f32.partialorder %v170_v4, 8.507059e+37 }
 0x23e   :  { %v694_v40 = vpop.eup %693 }
 0x23f   :  { %v292_v41 = vadd.f32 1.0, %v694_v40 }
 0x241   :  { %v696_v42 = vpop.eup %695  ;;  %697 = vrcp.f32 %v292_v41  ;;  %v304_v12 = vand.u32 2147483648, %v292_v41  ;;  %v302_v43 = vand.u32 2147483647, %v292_v41  ;;  %vm298_vm13 = vweird.f32 %v292_v41 }
 0x242   :  { %v162_v0 = vmul.f32 %v696_v42, %v160_v39  ;;  %vm167_vm8 = vweird.f32 %v696_v42  ;;  %699 = vpow2.f32 %v652_v23 }
 0x243   :  { %vm168_vm10 = vmor %vm166_vm9, %vm167_vm8  ;;  %v305_v16 = vor.u32 1.1754944e-38, %v304_v12  ;;  %vm303_vm15 = vcmp.eq.f32.partialorder %v302_v43, 8.507059e+37 }
 0x244   :  { %v163_v1 = vsub.f32 1.0, %v162_v0 }
 0x246   :  { %v164_v3 = vmul.f32 %v696_v42, %v163_v1 }
 0x247   :  { %v698_v5 = vpop.eup %697 }
 0x248   :  { %v165_v6 = vadd.f32 %v696_v42, %v164_v3  ;;  %v294_v7 = vmul.f32 %v698_v5, %v292_v41  ;;  %vm299_vm12 = vweird.f32 %v698_v5  ;;  %v700_v26 = vpop.eup %699 }
 0x249   :  { %vm300_vm14 = vmor %vm298_vm13, %vm299_vm12  ;;  %v225_v27 = vadd.f32 1.0, %v700_v26  ;;  %vm314_vm12 = vcmask 261120  }
 0x24a   :  { %v169_v9 = vsel %vm168_vm10, %v696_v42, %v165_v6  ;;  %v295_v10 = vsub.f32 1.0, %v294_v7 }
 0x24b   :  { %v174_v11 = vsel %vm171_vm11, %v173_v8, %v169_v9  ;;  %701 = vrcp.f32 %v225_v27  ;;  %vm231_vm5 = vweird.f32 %v225_v27  ;;  %v237_v32 = vand.u32 2147483648, %v225_v27 }
 0x24c   :  { %243 = vperm.xlu1 %686, %v174_v11   ;;  %v296_v13 = vmul.f32 %v698_v5, %v295_v10  ;;  %v235_v34 = vand.u32 2147483647, %v225_v27  ;;  %vm312_vm11 = vcmask 130048  }
 0x24d   :  { %v238_v35 = vor.u32 1.1754944e-38, %v237_v32 }
 0x24e   :  { %v297_v15 = vadd.f32 %v698_v5, %v296_v13  ;;  %vm236_vm10 = vcmp.eq.f32.partialorder %v235_v34, 8.507059e+37 }
 0x250   :  { %v301_v17 = vsel %vm300_vm14, %v698_v5, %v297_v15 }
 0x251   :  { %v306_v18 = vsel %vm303_vm15, %v305_v16, %v301_v17  ;;  %v702_v28 = vpop.eup %701 }
 0x252   :  { %309 = vrot.lane.b32.xlu0 %v306_v18, %s753_s2  ;;  %v227_v29 = vmul.f32 %v702_v28, %v225_v27  ;;  %vm232_vm8 = vweird.f32 %v702_v28 }
 0x253   :  { %vm233_vm9 = vmor %vm231_vm5, %vm232_vm8 }
 0x254   :  { %v228_v30 = vsub.f32 1.0, %v227_v29 }
 0x256   :  { %v229_v31 = vmul.f32 %v702_v28, %v228_v30 }
 0x258   :  { %v230_v33 = vadd.f32 %v702_v28, %v229_v31 }
 0x25a   :  { %v234_v44 = vsel %vm233_vm9, %v702_v28, %v230_v33 }
 0x25b   :  { %v239_v46 = vsel %vm236_vm10, %v238_v35, %v234_v44 }
 0x2be   :  { %v244_v45 = vpop.permute.xlu1 %243 }
 0x2bf   :  { %v246_v47 = vadd.f32 %v244_v45, %v239_v46 }
 0x2c4   :  { %v310_v49 = vpop.permute.xlu0 %309 }
 0x2c5   :  { %v313_v50 = vsel %vm312_vm11, %v246_v47, %v310_v49 }
 0x2c6   :  { %656 = vmatmul.msk.f32.vlgmr.msrb.gmra.mxu2 %vm314_vm12, %v313_v50  ;;  %657 = vmatmul.msk.f32.vlgmr.msrb.gmra.mxu3 %vm314_vm12, %v313_v50 }
 0x2ce   :  { %389 = vmatmul.f32.vlgmr.msra.gmra.mxu2 %v369_v51  ;;  %409 = vmatmul.f32.vlgmr.msra.gmra.mxu3 %v370_v52 }
 0x349   :  { %v335_v60 = vpop.f32.mrf.mxu2  ;;  %v355_v24 = vpop.f32.mrf.mxu3 }
 0x34a   :  { %v356_v38 = vadd.f32 1.0, %v355_v24  ;;  %v336_v39 = vadd.f32 1.0, %v335_v60 }
 0x34c   :  { %v360_v40 = vrot.slane %v356_v38, 4 }
 0x34e   :  { %v361_v41 = vsel %vm189_vm2, %v336_v39, %v360_v40 }
 0x34f   :  { %v363_v42 = vmul.f32 %v361_v41, %v875_v14 }
 0x351   :  { %364 = vst [vmem:[#allocation2] sm:$0xff] %v363_v42  ;;  %v390_v0 = vpop.f32.mrf.mxu2  ;;  %v410_v1 = vpop.f32.mrf.mxu3 }
 0x352   :  { %v411_v2 = vadd.f32 %v410_v1, %v390_v0 }
 0x354   :  { %521 = vrot.lane.b32.xlu2 %v411_v2, %s744_s18  ;;  %525 = vrot.lane.b32.xlu1 %v411_v2, %s742_s17  ;;  %v470_v3 = vrot.slane %v411_v2, 4  ;;  %v413_v4 = vsel %vm114_vm0, %v411_v2, 0.0 }
 0x356   :  { %529 = vrot.lane.b32.xlu0 %v470_v3, %s743_s1 }
 0x35c   :  { %466 = vrot.lane.b32.xlu1 %v411_v2, %s745_s19 }
 0x35e   :  { %462 = vrot.lane.b32.xlu0 %v411_v2, %s741_s16  ;;  %s754_s16 = smov [#allocation2]  }
 0x35f   :  { %s635_s17 = sshll.u32 %s754_s16, 4  ;;  %s636_s17 = int_to_ptr.vmem [resolvable:$true] %s635_s17 }
 0x386   :  { %414 = vadd.xlane.f32.xlu1 %v413_v4 }
 0x3ae   :  { %v522_v5 = vpop.permute.xlu2 %521 }
 0x3af   :  { %v524_v7 = vsel %vm180_vm3, 0.0, %v522_v5 }
 0x3c6   :  { %v526_v14 = vpop.permute.xlu1 %525 }
 0x3c7   :  { %v528_v6 = vsel %vm185_vm1, %v526_v14, 0.0 }
 0x3c8   :  { %663 = vmatpush.msk.msrb.mxu1 %vm189_vm2, %v528_v6  ;;  %v530_v8 = vpop.permute.xlu0 %529 }
 0x3c9   :  { %v532_v9 = vsel %vm189_vm2, %v524_v7, %v530_v8 }
 0x3ca   :  { %551 = vmatpush.msrb.mxu1 %v532_v9 }
 0x3cb   :  { %664 = vmatmul.msk.f32.vlgmr.msrb.gmra.mxu1 %vm195_vm4, %v1013_v53 }
 0x3cc   :  { %615 = vmatpush.msra.mxu1 %v1054_v55 }
 0x3ce   :  { %v467_v10 = vpop.permute.xlu1 %466  ;;  %616 = vmatpush.msra.mxu1 %v1068_v58 }
 0x3cf   :  { %v469_v11 = vsel %vm185_vm1, %v467_v10, 0.0 }
 0x3d0   :  { %660 = vmatpush.msk.msrb.mxu0 %vm189_vm2, %v469_v11  ;;  %v463_v12 = vpop.permute.xlu0 %462  ;;  %617 = vmatpush.msra.mxu1 %v1079_v63 }
 0x3d1   :  { %v465_v13 = vsel %vm180_vm3, 0.0, %v463_v12 }
 0x3d2   :  { %v472_v43 = vsel %vm189_vm2, %v465_v13, %v470_v3  ;;  %618 = vmatpush.msra.mxu1 %v1091_v36 }
 0x3d3   :  { %491 = vmatpush.msrb.mxu0 %v472_v43 }
 0x3d4   :  { %661 = vmatmul.msk.f32.vlgmr.msrb.gmra.mxu0 %vm195_vm4, %v1033_v37 }
 0x3d5   :  { %595 = vmatpush.msra.mxu0 %v1049_v54 }
 0x3d7   :  { %596 = vmatpush.msra.mxu0 %v1059_v56 }
 0x3d9   :  { %597 = vmatpush.msra.mxu0 %v1074_v62 }
 0x3db   :  { %598 = vmatpush.msra.mxu0 %v1086_v25 }
 0x3f9   :  { %v415_v53 = vpop.xlane.xlu1 %414 }
 0x3fa   :  { %v416_v55 = vmul.f32 %v415_v53, %v1017_v59 }
 0x3fc   :  { %v425_v58 = vmul.f32 %v416_v55, %v1022_v61  ;;  %v421_v63 = vrot.slane %v416_v55, 1  ;;  %v418_v29 = vrot.slane %v416_v55, 7 }
 0x3fe   :  { %427 = vrot.lane.b32.xlu2 %v425_v58, %s745_s19  ;;  %v423_v36 = vsel %vm133_vm6, %v421_v63, 0.0  ;;  %v420_v30 = vsel %vm129_vm7, 0.0, %v418_v29  ;;  %s637_s19 = sshll.u32 %s1191_s6, 4  ;;  %s638_s19 = int_to_ptr.hbm [resolvable:$true] %s637_s19 }
 0x3ff   :  { %432 = vrot.lane.b32.xlu0 %v423_v36, %s747_s4  ;;  %v424_v32 = vmul.f32 %v420_v30, %v1022_v61 }
 0x448   :  { %v553_v37 = vpop.f32.mrf.mxu1 }
 0x449   :  { %v554_v54 = vadd.f32 %v553_v37, %v1061_v57 }
 0x44b   :  { %v665_v56 = vmul.f32 -1.442695, %v554_v54 }
 0x44d   :  { %703 = vpow2.f32 %v665_v56 }
 0x453   :  { %v704_v62 = vpop.eup %703 }
 0x454   :  { %v559_v15 = vadd.f32 1.0, %v704_v62 }
 0x456   :  { %705 = vrcp.f32 %v559_v15  ;;  %v571_v23 = vand.u32 2147483648, %v559_v15  ;;  %vm565_vm1 = vweird.f32 %v559_v15  ;;  %v569_v26 = vand.u32 2147483647, %v559_v15 }
 0x458   :  { %v572_v27 = vor.u32 1.1754944e-38, %v571_v23  ;;  %vm570_vm4 = vcmp.eq.f32.partialorder %v569_v26, 8.507059e+37  ;;  %v428_v31 = vpop.permute.xlu2 %427 }
 0x459   :  { %v430_v33 = vadd.f32 %v428_v31, %v424_v32 }
 0x45c   :  { %v706_v25 = vpop.eup %705 }
 0x45d   :  { %v561_v16 = vmul.f32 %v706_v25, %v559_v15  ;;  %vm566_vm0 = vweird.f32 %v706_v25 }
 0x45e   :  { %vm567_vm3 = vmor %vm565_vm1, %vm566_vm0 }
 0x45f   :  { %v562_v59 = vsub.f32 1.0, %v561_v16 }
 0x461   :  { %v563_v17 = vmul.f32 %v706_v25, %v562_v59 }
 0x463   :  { %v564_v22 = vadd.f32 %v706_v25, %v563_v17 }
 0x465   :  { %v568_v57 = vsel %vm567_vm3, %v706_v25, %v564_v22 }
 0x466   :  { %v573_v28 = vsel %vm570_vm4, %v572_v27, %v568_v57 }
 0x471   :  { %v433_v18 = vpop.permute.xlu0 %432 }
 0x472   :  { %v435_v19 = vmul.f32 %v433_v18, %v1022_v61 }
 0x474   :  { %437 = vrot.lane.b32.xlu0 %v435_v19, %s751_s25 }
 0x47c   :  { %576 = vrot.lane.b32.xlu0 %v573_v28, %s753_s2 }
 0x4e6   :  { %v438_v34 = vpop.permute.xlu0 %437 }
 0x4e7   :  { %v440_v35 = vadd.f32 %v438_v34, %v430_v33 }
 0x4e9   :  { %v441_v44 = vadd.f32 %v440_v35, %v1043_v48  ;;  %v493_v48 = vpop.f32.mrf.mxu0 }
 0x4ea   :  { %v494_v41 = vadd.f32 %v493_v48, %v1130_v20 }
 0x4eb   :  { %v659_v45 = vmul.f32 -1.442695, %v441_v44 }
 0x4ec   :  { %v662_v42 = vmul.f32 -1.442695, %v494_v41 }
 0x4ed   :  { %707 = vpow2.f32 %v659_v45 }
 0x4ee   :  { %v577_v12 = vpop.permute.xlu0 %576 }
 0x4f3   :  { %v708_v46 = vpop.eup %707 }
 0x4f4   :  { %v445_v47 = vadd.f32 1.0, %v708_v46 }
 0x4f6   :  { %709 = vrcp.f32 %v445_v47  ;;  %v457_v52 = vand.u32 2147483648, %v445_v47  ;;  %v455_v24 = vand.u32 2147483647, %v445_v47  ;;  %vm451_vm7 = vweird.f32 %v445_v47 }
 0x4f7   :  { %711 = vpow2.f32 %v662_v42 }
 0x4f8   :  { %v458_v61 = vor.u32 1.1754944e-38, %v457_v52  ;;  %vm456_vm14 = vcmp.eq.f32.partialorder %v455_v24, 8.507059e+37 }
 0x4fc   :  { %v710_v49 = vpop.eup %709 }
 0x4fd   :  { %v447_v50 = vmul.f32 %v710_v49, %v445_v47  ;;  %vm452_vm6 = vweird.f32 %v710_v49  ;;  %v712_v0 = vpop.eup %711 }
 0x4fe   :  { %vm453_vm13 = vmor %vm451_vm7, %vm452_vm6  ;;  %v499_v1 = vadd.f32 1.0, %v712_v0 }
 0x4ff   :  { %v448_v51 = vsub.f32 1.0, %v447_v50 }
 0x500   :  { %713 = vrcp.f32 %v499_v1  ;;  %v511_v6 = vand.u32 2147483648, %v499_v1  ;;  %vm505_vm5 = vweird.f32 %v499_v1  ;;  %v509_v7 = vand.u32 2147483647, %v499_v1 }
 0x501   :  { %v449_v60 = vmul.f32 %v710_v49, %v448_v51 }
 0x502   :  { %v512_v9 = vor.u32 1.1754944e-38, %v511_v6  ;;  %vm510_vm9 = vcmp.eq.f32.partialorder %v509_v7, 8.507059e+37 }
 0x503   :  { %v450_v38 = vadd.f32 %v710_v49, %v449_v60 }
 0x505   :  { %v454_v39 = vsel %vm453_vm13, %v710_v49, %v450_v38 }
 0x506   :  { %v459_v40 = vsel %vm456_vm14, %v458_v61, %v454_v39  ;;  %v714_v2 = vpop.eup %713 }
 0x507   :  { %517 = vperm.xlu2 %687, %v459_v40   ;;  %v501_v3 = vmul.f32 %v714_v2, %v499_v1  ;;  %vm506_vm15 = vweird.f32 %v714_v2 }
 0x508   :  { %vm507_vm8 = vmor %vm505_vm5, %vm506_vm15 }
 0x509   :  { %v502_v4 = vsub.f32 1.0, %v501_v3 }
 0x50b   :  { %v503_v5 = vmul.f32 %v714_v2, %v502_v4 }
 0x50d   :  { %v504_v14 = vadd.f32 %v714_v2, %v503_v5 }
 0x50f   :  { %v508_v8 = vsel %vm507_vm8, %v714_v2, %v504_v14 }
 0x510   :  { %v513_v10 = vsel %vm510_vm9, %v512_v9, %v508_v8 }
 0x561   :  { %v518_v20 = vpop.permute.xlu2 %517 }
 0x562   :  { %v520_v11 = vadd.f32 %v518_v20, %v513_v10 }
 0x564   :  { %v579_v13 = vsel %vm312_vm11, %v520_v11, %v577_v12 }
 0x565   :  { %666 = vmatmul.msk.f32.vlgmr.msra.gmra.mxu0 %vm314_vm12, %v579_v13  ;;  %667 = vmatmul.msk.f32.vlgmr.msra.gmra.mxu1 %vm314_vm12, %v579_v13 }
 0x5e2   :  { %v600_v43 = vpop.f32.mrf.mxu0  ;;  %v620_v53 = vpop.f32.mrf.mxu1 }
 0x5e3   :  { %v621_v55 = vadd.f32 1.0, %v620_v53  ;;  %v601_v58 = vadd.f32 1.0, %v600_v43 }
 0x5e5   :  { %v625_v63 = vrot.slane %v621_v55, 4 }
 0x5e7   :  { %v626_v36 = vsel %vm189_vm2, %v601_v58, %v625_v63 }
 0x5e8   :  { %v628_v37 = vmul.f32 %v917_v21, %v626_v36 }
 0x5ea   :  { %630 = vst [vmem:[#allocation2 + $0x8] sm:$0xff] %v628_v37 }
 0x5eb   :  { %643 = dma.vmem_to_hbm [thread:$0]  %s636_s17, 256, %s638_s19, [#allocation3], %s755_s0, %s755_s0, %s756_s21  }
 0x5ec   :  { %739 = dma.done.wait [#allocation3], 256  }
 0x5ed   :  { %740 = vsyncadd [#allocation3], 4294967040 }
 0x5ee   :  { %648 = vsyncpa [#allocation3], 1 }

</bundles_post_ra>
